<compile_context>
chip_gen: v5e
topology: v5e:2x2
jax: 0.10.0
libtpu: 0.0.40
codegen_flags: <defaults>
</compile_context>

<pallas_src>
import jax
import jax.numpy as jnp
from jax.experimental import pallas as pl
from jax.experimental.pallas import tpu as pltpu


def _round_up(v, m):
    return ((v + m - 1) // m) * m


def _num_tensorcores():
    """Best-effort TensorCores-per-chip detection (v7x has 2, v5e/v6e have 1)."""
    try:
        kind = jax.devices()[0].device_kind.lower()
        if "v7" in kind or "7x" in kind:
            return 2
    except Exception:
        pass
    return 1


def _choose_tile(n, num_cores, cap=1024):
    """Pick the lane (N) tile.

    Single TC: one grid step whenever the vector fits under the vreg-pressure
    cap (each extra grid step costs ~0.35us, more than this tile's compute).
    Two TCs (v7x): at least two steps so both cores get work under
    dimension_semantics=('parallel',).
    """
    if num_cores >= 2 and n > 256:
        return min(cap, max(128, _round_up(-(-n // 2), 128)))
    return n if n <= cap else cap


def _make_rbf_kernel(return_r):
    def kernel(x_ref, c_ref, s_ref, w_ref, *out_refs):
        if return_r:
            r_ref, pred_ref = out_refs
        else:
            (pred_ref,) = out_refs

        x = x_ref[...]                    # (1, TN)  lane-dense sample tile
        c = c_ref[...]                    # (K, 1)
        s = s_ref[...]                    # (K, 1)
        w = w_ref[...]                    # (F, K)

        # Exact divide on just K elements (tiny (K,1) tile) instead of K*TN
        # reciprocals on the EUP.
        neg_inv_s2 = -1.0 / (s * s)       # (K, 1)

        diff = x - c                      # (K, TN) sublane broadcast of x
        r = jnp.exp((diff * diff) * neg_inv_s2)

        if return_r:
            r_ref[...] = r.astype(r_ref.dtype)

        # K = F = 8: an 8x8 MXU matmul is pure fill/drain latency, so use an
        # unrolled VPU broadcast-MAC chain over K with f32 accumulation.
        k_dim = w.shape[1]
        acc = jnp.zeros(pred_ref.shape, jnp.float32)
        for kk in range(k_dim):
            acc = acc + w[:, kk:kk + 1] * r[kk:kk + 1, :]   # (F,1)*(1,TN)
        pred_ref[...] = acc.astype(pred_ref.dtype)

    return kernel


def multi_rbf_forward(x, centers, sigma, weights, *,
                      return_r=True, r_dtype=jnp.float32, tn=None):
    """Pallas TPU forward for MultiRBFnn.

    x       : (N,) sample coordinates, or (B, N) batch of sample vectors.
    centers : (K, 1) float32
    sigma   : (K, 1) float32
    weights : (F, K) float32

    Returns (R, pred) with shapes (K, N)/(F, N) — or (B,K,N)/(B,F,N) when
    batched.  With return_r=False only pred is returned (skips the R HBM
    writeback entirely).
    """
    x = jnp.asarray(x, jnp.float32)
    centers = jnp.asarray(centers, jnp.float32)
    sigma = jnp.asarray(sigma, jnp.float32)
    weights = jnp.asarray(weights, jnp.float32)

    if x.ndim == 1:
        batched, bsz, n = False, 1, x.shape[0]
    elif x.ndim == 2:
        batched, (bsz, n) = True, x.shape
    else:
        raise ValueError("x must be (N,) or (B, N)")

    k = centers.shape[0]
    f = weights.shape[0]

    num_cores = _num_tensorcores()
    tile_cores = 1 if (batched and bsz > 1) else num_cores   # batch axis already parallel
    if tn is None:
        tn = _choose_tile(n, tile_cores)
    tn = min(tn, n)
    if tn != n:
        tn = max(128, (tn // 128) * 128)   # lane-multiple tiles when actually tiling
    n_tiles = pl.cdiv(n, tn)

    kernel = _make_rbf_kernel(return_r)

    r_bytes = (bsz * k * n * jnp.dtype(r_dtype).itemsize) if return_r else 0
    cost = pl.CostEstimate(
        flops=2 * f * k * n * bsz,
        transcendentals=k * n * bsz,
        bytes_accessed=4 * (bsz * n + 2 * k + f * k + f * n * bsz) + r_bytes,
    )

    out_shape, out_specs = [], []
    if not batched:
        x_in = x.reshape(1, n)                                # free reshape
        in_specs = [
            pl.BlockSpec((1, tn), lambda i: (0, i)),          # x tile
            pl.BlockSpec((k, 1), lambda i: (0, 0)),           # centers (resident)
            pl.BlockSpec((k, 1), lambda i: (0, 0)),           # sigma   (resident)
            pl.BlockSpec((f, k), lambda i: (0, 0)),           # weights (resident)
        ]
        if return_r:
            out_shape.append(jax.ShapeDtypeStruct((k, n), r_dtype))
            out_specs.append(pl.BlockSpec((k, tn), lambda i: (0, i)))
        out_shape.append(jax.ShapeDtypeStruct((f, n), jnp.float32))
        out_specs.append(pl.BlockSpec((f, tn), lambda i: (0, i)))
        grid = (n_tiles,)
        dims = ("parallel",)
    else:
        x_in = x.reshape(bsz, 1, n)                           # free reshape (unit axis)
        in_specs = [
            pl.BlockSpec((None, 1, tn), lambda b, i: (b, 0, i)),
            pl.BlockSpec((k, 1), lambda b, i: (0, 0)),
            pl.BlockSpec((k, 1), lambda b, i: (0, 0)),
            pl.BlockSpec((f, k), lambda b, i: (0, 0)),
        ]
        if return_r:
            out_shape.append(jax.ShapeDtypeStruct((bsz, k, n), r_dtype))
            out_specs.append(pl.BlockSpec((None, k, tn), lambda b, i: (b, 0, i)))
        out_shape.append(jax.ShapeDtypeStruct((bsz, f, n), jnp.float32))
        out_specs.append(pl.BlockSpec((None, f, tn), lambda b, i: (b, 0, i)))
        grid = (bsz, n_tiles)
        dims = ("parallel", "parallel")

    outs = pl.pallas_call(
        kernel,
        out_shape=tuple(out_shape),
        grid_spec=pl.GridSpec(grid=grid, in_specs=in_specs, out_specs=out_specs),
        compiler_params=pltpu.CompilerParams(dimension_semantics=dims),
        cost_estimate=cost,
    )(x_in, centers, sigma, weights)

    if return_r:
        return outs[0], outs[1]
    return outs[0]


if __name__ == "__main__":
    # Module hyperparameters (synthetic, deterministic).
    in_feature = 8      # F
    add_rbf_num = 8     # K
    n_samples = 1000    # N (non-multiple of 128 to exercise true-N outputs)

    key = jax.random.PRNGKey(0)
    kx, kc, ks, kw, kb = jax.random.split(key, 5)

    x = jnp.sort(jax.random.uniform(kx, (n_samples,), jnp.float32, -1.0, 1.0))
    centers = jax.random.uniform(kc, (add_rbf_num, 1), jnp.float32, -1.0, 1.0)
    sigma = jax.random.uniform(ks, (add_rbf_num, 1), jnp.float32, 0.2, 1.0)
    weights = jax.random.normal(kw, (in_feature, add_rbf_num), jnp.float32)

    # Pure-JAX reference (matches the PyTorch formula).
    R_ref = jnp.exp(-jnp.square(x[None, :] - centers) / jnp.square(sigma))
    pred_ref = weights @ R_ref

    # 1) Full forward (R, pred) — matches module.forward.
    R, pred = multi_rbf_forward(x, centers, sigma, weights)
    jax.block_until_ready((R, pred))
    assert R.shape == (add_rbf_num, n_samples)
    assert pred.shape == (in_feature, n_samples)
    assert jnp.allclose(R, R_ref, atol=1e-5, rtol=1e-5)
    assert jnp.allclose(pred, pred_ref, atol=1e-4, rtol=1e-4)

    # 2) pred-only fast path (skips the R HBM writeback).
    pred_only = multi_rbf_forward(x, centers, sigma, weights, return_r=False)
    jax.block_until_ready(pred_only)
    assert jnp.allclose(pred_only, pred_ref, atol=1e-4, rtol=1e-4)

    # 3) Batched path: B sample vectors in a single dispatch.
    B = 4
    xb = jax.random.uniform(kb, (B, n_samples), jnp.float32, -1.0, 1.0)
    Rb, predb = multi_rbf_forward(xb, centers, sigma, weights)
    jax.block_until_ready((Rb, predb))
    Rb_ref = jnp.exp(-jnp.square(xb[:, None, :] - centers[None]) / jnp.square(sigma)[None])
    predb_ref = jnp.einsum("fk,bkn->bfn", weights, Rb_ref)
    assert Rb.shape == (B, add_rbf_num, n_samples)
    assert predb.shape == (B, in_feature, n_samples)
    assert jnp.allclose(Rb, Rb_ref, atol=1e-5, rtol=1e-5)
    assert jnp.allclose(predb, predb_ref, atol=1e-4, rtol=1e-4)

    # TODO(synk): the FFT-based parameter init (first/add_rbf_parameter), the
    # manual BP update and the train() loop are host-side control logic in the
    # PyTorch module and are intentionally not kernelized.
    print("KERNEL_OK")
</pallas_src>

<mosaic_0001>
module attributes {stable_mosaic.version = 11 : i64} {
  func.func @kernel(%arg0: i32, %arg1: memref<1x1000xf32, #tpu.memory_space<vmem>>, %arg2: memref<8x1xf32, #tpu.memory_space<vmem>>, %arg3: memref<8x1xf32, #tpu.memory_space<vmem>>, %arg4: memref<8x8xf32, #tpu.memory_space<vmem>>, %arg5: memref<8x1000xf32, #tpu.memory_space<vmem>>, %arg6: memref<8x1000xf32, #tpu.memory_space<vmem>>) attributes {dimension_semantics = [#tpu.dimension_semantics<parallel>], iteration_bounds = array<i64: 1>, scalar_prefetch = 0 : i64, scratch_operands = 0 : i64, tpu.core_type = #tpu.core_type<tc>, window_params = [{transform_indices = @transform_0, window_bounds = array<i64: 1, 1000>}, {pipeline_mode = #tpu.pipeline_mode<synchronous>, transform_indices = @transform_1, window_bounds = array<i64: 8, 1>}, {pipeline_mode = #tpu.pipeline_mode<synchronous>, transform_indices = @transform_2, window_bounds = array<i64: 8, 1>}, {pipeline_mode = #tpu.pipeline_mode<synchronous>, transform_indices = @transform_3, window_bounds = array<i64: 8, 8>}, {transform_indices = @transform_4, window_bounds = array<i64: 8, 1000>}, {transform_indices = @transform_5, window_bounds = array<i64: 8, 1000>}]} {
    %c0 = arith.constant 0 : index
    %c0_0 = arith.constant 0 : index
    %0 = vector.load %arg1[%c0, %c0_0] : memref<1x1000xf32, #tpu.memory_space<vmem>>, vector<1x1000xf32>
    %c0_1 = arith.constant 0 : index
    %c0_2 = arith.constant 0 : index
    %1 = vector.load %arg2[%c0_1, %c0_2] : memref<8x1xf32, #tpu.memory_space<vmem>>, vector<8x1xf32>
    %c0_3 = arith.constant 0 : index
    %c0_4 = arith.constant 0 : index
    %2 = vector.load %arg3[%c0_3, %c0_4] : memref<8x1xf32, #tpu.memory_space<vmem>>, vector<8x1xf32>
    %c0_5 = arith.constant 0 : index
    %c0_6 = arith.constant 0 : index
    %3 = vector.load %arg4[%c0_5, %c0_6] : memref<8x8xf32, #tpu.memory_space<vmem>>, vector<8x8xf32>
    %4 = arith.mulf %2, %2 : vector<8x1xf32>
    %cst = arith.constant -1.000000e+00 : f32
    %5 = vector.broadcast %cst : f32 to vector<8x1xf32>
    %6 = arith.divf %5, %4 : vector<8x1xf32>
    %7 = vector.broadcast %0 : vector<1x1000xf32> to vector<8x1000xf32>
    %8 = vector.broadcast %1 : vector<8x1xf32> to vector<8x1000xf32>
    %9 = arith.subf %7, %8 : vector<8x1000xf32>
    %10 = arith.mulf %9, %9 : vector<8x1000xf32>
    %11 = vector.broadcast %6 : vector<8x1xf32> to vector<8x1000xf32>
    %12 = arith.mulf %10, %11 : vector<8x1000xf32>
    %13 = math.exp %12 : vector<8x1000xf32>
    %c0_7 = arith.constant 0 : index
    %c0_8 = arith.constant 0 : index
    %14 = vector.load %arg5[%c0_7, %c0_8] : memref<8x1000xf32, #tpu.memory_space<vmem>>, vector<8x1000xf32>
    tpu.vector_store %arg5[%c0_7, %c0_8], %13 {strides = array<i32>} : memref<8x1000xf32, #tpu.memory_space<vmem>>, vector<8x1000xf32>,
    %cst_9 = arith.constant 0.000000e+00 : f32
    %15 = vector.broadcast %cst_9 : f32 to vector<8x1000xf32>
    %16 = vector.extract_strided_slice %3 {offsets = [0, 0], sizes = [8, 1], strides = [1, 1]} : vector<8x8xf32> to vector<8x1xf32>
    %17 = vector.extract_strided_slice %13 {offsets = [0, 0], sizes = [1, 1000], strides = [1, 1]} : vector<8x1000xf32> to vector<1x1000xf32>
    %18 = vector.broadcast %16 : vector<8x1xf32> to vector<8x1000xf32>
    %19 = vector.broadcast %17 : vector<1x1000xf32> to vector<8x1000xf32>
    %20 = arith.mulf %18, %19 : vector<8x1000xf32>
    %21 = arith.addf %15, %20 : vector<8x1000xf32>
    %22 = vector.extract_strided_slice %3 {offsets = [0, 1], sizes = [8, 1], strides = [1, 1]} : vector<8x8xf32> to vector<8x1xf32>
    %23 = vector.extract_strided_slice %13 {offsets = [1, 0], sizes = [1, 1000], strides = [1, 1]} : vector<8x1000xf32> to vector<1x1000xf32>
    %24 = vector.broadcast %22 : vector<8x1xf32> to vector<8x1000xf32>
    %25 = vector.broadcast %23 : vector<1x1000xf32> to vector<8x1000xf32>
    %26 = arith.mulf %24, %25 : vector<8x1000xf32>
    %27 = arith.addf %21, %26 : vector<8x1000xf32>
    %28 = vector.extract_strided_slice %3 {offsets = [0, 2], sizes = [8, 1], strides = [1, 1]} : vector<8x8xf32> to vector<8x1xf32>
    %29 = vector.extract_strided_slice %13 {offsets = [2, 0], sizes = [1, 1000], strides = [1, 1]} : vector<8x1000xf32> to vector<1x1000xf32>
    %30 = vector.broadcast %28 : vector<8x1xf32> to vector<8x1000xf32>
    %31 = vector.broadcast %29 : vector<1x1000xf32> to vector<8x1000xf32>
    %32 = arith.mulf %30, %31 : vector<8x1000xf32>
    %33 = arith.addf %27, %32 : vector<8x1000xf32>
    %34 = vector.extract_strided_slice %3 {offsets = [0, 3], sizes = [8, 1], strides = [1, 1]} : vector<8x8xf32> to vector<8x1xf32>
    %35 = vector.extract_strided_slice %13 {offsets = [3, 0], sizes = [1, 1000], strides = [1, 1]} : vector<8x1000xf32> to vector<1x1000xf32>
    %36 = vector.broadcast %34 : vector<8x1xf32> to vector<8x1000xf32>
    %37 = vector.broadcast %35 : vector<1x1000xf32> to vector<8x1000xf32>
    %38 = arith.mulf %36, %37 : vector<8x1000xf32>
    %39 = arith.addf %33, %38 : vector<8x1000xf32>
    %40 = vector.extract_strided_slice %3 {offsets = [0, 4], sizes = [8, 1], strides = [1, 1]} : vector<8x8xf32> to vector<8x1xf32>
    %41 = vector.extract_strided_slice %13 {offsets = [4, 0], sizes = [1, 1000], strides = [1, 1]} : vector<8x1000xf32> to vector<1x1000xf32>
    %42 = vector.broadcast %40 : vector<8x1xf32> to vector<8x1000xf32>
    %43 = vector.broadcast %41 : vector<1x1000xf32> to vector<8x1000xf32>
    %44 = arith.mulf %42, %43 : vector<8x1000xf32>
    %45 = arith.addf %39, %44 : vector<8x1000xf32>
    %46 = vector.extract_strided_slice %3 {offsets = [0, 5], sizes = [8, 1], strides = [1, 1]} : vector<8x8xf32> to vector<8x1xf32>
    %47 = vector.extract_strided_slice %13 {offsets = [5, 0], sizes = [1, 1000], strides = [1, 1]} : vector<8x1000xf32> to vector<1x1000xf32>
    %48 = vector.broadcast %46 : vector<8x1xf32> to vector<8x1000xf32>
    %49 = vector.broadcast %47 : vector<1x1000xf32> to vector<8x1000xf32>
    %50 = arith.mulf %48, %49 : vector<8x1000xf32>
    %51 = arith.addf %45, %50 : vector<8x1000xf32>
    %52 = vector.extract_strided_slice %3 {offsets = [0, 6], sizes = [8, 1], strides = [1, 1]} : vector<8x8xf32> to vector<8x1xf32>
    %53 = vector.extract_strided_slice %13 {offsets = [6, 0], sizes = [1, 1000], strides = [1, 1]} : vector<8x1000xf32> to vector<1x1000xf32>
    %54 = vector.broadcast %52 : vector<8x1xf32> to vector<8x1000xf32>
    %55 = vector.broadcast %53 : vector<1x1000xf32> to vector<8x1000xf32>
    %56 = arith.mulf %54, %55 : vector<8x1000xf32>
    %57 = arith.addf %51, %56 : vector<8x1000xf32>
    %58 = vector.extract_strided_slice %3 {offsets = [0, 7], sizes = [8, 1], strides = [1, 1]} : vector<8x8xf32> to vector<8x1xf32>
    %59 = vector.extract_strided_slice %13 {offsets = [7, 0], sizes = [1, 1000], strides = [1, 1]} : vector<8x1000xf32> to vector<1x1000xf32>
    %60 = vector.broadcast %58 : vector<8x1xf32> to vector<8x1000xf32>
    %61 = vector.broadcast %59 : vector<1x1000xf32> to vector<8x1000xf32>
    %62 = arith.mulf %60, %61 : vector<8x1000xf32>
    %63 = arith.addf %57, %62 : vector<8x1000xf32>
    %c0_10 = arith.constant 0 : index
    %c0_11 = arith.constant 0 : index
    %64 = vector.load %arg6[%c0_10, %c0_11] : memref<8x1000xf32, #tpu.memory_space<vmem>>, vector<8x1000xf32>
    tpu.vector_store %arg6[%c0_10, %c0_11], %63 {strides = array<i32>} : memref<8x1000xf32, #tpu.memory_space<vmem>>, vector<8x1000xf32>,
    return
  }
  func.func @transform_0(%arg0: i32) -> (i32, i32) {
    %c0_i32 = arith.constant 0 : i32
    %c0_i32_0 = arith.constant 0 : i32
    return %c0_i32, %arg0 : i32, i32
  }
  func.func @transform_1(%arg0: i32) -> (i32, i32) {
    %c0_i32 = arith.constant 0 : i32
    %c0_i32_0 = arith.constant 0 : i32
    %c0_i32_1 = arith.constant 0 : i32
    return %c0_i32, %c0_i32_0 : i32, i32
  }
  func.func @transform_2(%arg0: i32) -> (i32, i32) {
    %c0_i32 = arith.constant 0 : i32
    %c0_i32_0 = arith.constant 0 : i32
    %c0_i32_1 = arith.constant 0 : i32
    return %c0_i32, %c0_i32_0 : i32, i32
  }
  func.func @transform_3(%arg0: i32) -> (i32, i32) {
    %c0_i32 = arith.constant 0 : i32
    %c0_i32_0 = arith.constant 0 : i32
    %c0_i32_1 = arith.constant 0 : i32
    return %c0_i32, %c0_i32_0 : i32, i32
  }
  func.func @transform_4(%arg0: i32) -> (i32, i32) {
    %c0_i32 = arith.constant 0 : i32
    %c0_i32_0 = arith.constant 0 : i32
    return %c0_i32, %arg0 : i32, i32
  }
  func.func @transform_5(%arg0: i32) -> (i32, i32) {
    %c0_i32 = arith.constant 0 : i32
    %c0_i32_0 = arith.constant 0 : i32
    return %c0_i32, %arg0 : i32, i32
  }
}

</mosaic_0001>

<bundles_post_ra>
// kernel: tpu_custom_call.1
= control target key start
LH: loop header
LB: loop body
LE: loop exit
PB: predicated region body
PF: predicated region fallthrough
CT: control target
= control target key end

     0   :  { %11 = vsyncpa [#allocation3], 0  ;;  %v472_v3 = vmov 0   ;;  %s765_s0 = inlined_call_operand.vmem [shape: f32[1,1000], index: 0, kind: input, shape index: {}]   ;;  %s766_s1 = inlined_call_operand.vmem [shape: f32[8,1], index: 1, kind: input, shape index: {}]   ;;  %s767_s2 = inlined_call_operand.vmem [shape: f32[8,1], index: 2, kind: input, shape index: {}]   ;;  %s768_s3 = inlined_call_operand.vmem [shape: f32[8,8], index: 3, kind: input, shape index: {}]   ;;  %s769_s4 = inlined_call_operand.hbm [shape: f32[8,1000], index: 4, kind: output, shape index: {0}]   ;;  %s770_s5 = inlined_call_operand.hbm [shape: f32[8,1000], index: 5, kind: output, shape index: {1}]  }
   0x1   :  { %v24_v0 = vld [vmem:[%s768_s3] sm:$0xff]  ;;  %393 = vset.pattern.permute.xlu1 %v472_v3  ;;  %392 = vset.pattern.permute.xlu0 %v472_v3 }
   0x2   :  { %v22_v1 = vld [vmem:[%s766_s1] sm:$0xff] }
   0x3   :  { %v23_v2 = vld [vmem:[%s767_s2] sm:$0xff] }
   0x4   :  { %v25_v4 = vmul.f32 %v23_v2, %v23_v2 }
   0x5   :  { %12 = vsyncpa [#allocation5], 0  ;;  %119 = vperm.xlu1 %393, %v24_v0   ;;  %60 = vperm.xlu0 %392, %v22_v1   ;;  %v473_v5 = vmov 2   ;;  %v474_v7 = vmov 1   ;;  %v475_v12 = vmov 3   ;;  %v476_v18 = vmov 5  }
   0x6   :  { %402 = vrcp.f32 %v25_v4  ;;  %395 = vset.pattern.permute.xlu2 %v473_v5  ;;  %v37_v9 = vand.u32 2147483648, %v25_v4  ;;  %vm31_vm0 = vweird.f32 %v25_v4  ;;  %v35_v11 = vand.u32 2147483647, %v25_v4  ;;  %v21_v23 = vld [vmem:[%s765_s0] sm:$0xff]  ;;  %s480_s0 = smov [#allocation2]   ;;  %s357_s26 = sshll.u32 %s769_s4, 4  ;;  %s358_s26 = int_to_ptr.hbm [resolvable:$true] %s357_s26 }
   0x7   :  { %175 = vperm.xlu2 %395, %v24_v0   ;;  %v477_v20 = vmov 6   ;;  %v478_v21 = vmov 7   ;;  %v479_v22 = vmov 4   ;;  %v42_v25 = vperm.slane %v21_v23, 0  ;;  %s544_s3 = sshll.u32 %s480_s0, 4  ;;  %s481_s4 = smov [#allocation4]   ;;  %s356_s3 = int_to_ptr.vmem [resolvable:$true] %s544_s3 }
   0x8   :  { %v38_v14 = vor.u32 1.1754944e-38, %v37_v9  ;;  %vm36_vm3 = vcmp.eq.f32.partialorder %v35_v11, 8.507059e+37  ;;  %v43_v26 = vperm.slane %v21_v23, 1  ;;  %v44_v27 = vperm.slane %v21_v23, 2  ;;  %s366_s27 = sshll.u32 %s481_s4, 4  ;;  %s368_s30 = sshll.u32 %s770_s5, 4  ;;  %s367_s27 = int_to_ptr.vmem [resolvable:$true] %s366_s27  ;;  %s369_s30 = int_to_ptr.hbm [resolvable:$true] %s368_s30 }
   0x9   :  { %v45_v28 = vperm.slane %v21_v23, 3  ;;  %v46_v29 = vperm.slane %v21_v23, 4  ;;  %v47_v30 = vperm.slane %v21_v23, 5  ;;  %v48_v31 = vperm.slane %v21_v23, 6 }
   0xa   :  { %v49_v33 = vperm.slane %v21_v23, 7  ;;  %vm115_vm4 = vcmask 850944  }
   0xc   :  { %v403_v6 = vpop.eup %402 }
   0xd   :  { %394 = vset.pattern.permute.xlu1 %v474_v7  ;;  %v27_v8 = vmul.f32 %v403_v6, %v25_v4  ;;  %vm32_vm1 = vweird.f32 %v403_v6 }
   0xe   :  { %147 = vperm.xlu1 %394, %v24_v0   ;;  %vm33_vm2 = vmor %vm31_vm0, %vm32_vm1 }
   0xf   :  { %v28_v10 = vsub.f32 1.0, %v27_v8  ;;  %396 = vset.pattern.permute.xlu2 %v475_v12 }
  0x10   :  { %203 = vperm.xlu2 %396, %v24_v0  }
  0x11   :  { %v29_v13 = vmul.f32 %v403_v6, %v28_v10 }
  0x13   :  { %v30_v15 = vadd.f32 %v403_v6, %v29_v13 }
  0x15   :  { %v34_v16 = vsel %vm33_vm2, %v403_v6, %v30_v15 }
  0x16   :  { %v39_v17 = vsel %vm36_vm3, %v38_v14, %v34_v16  ;;  %398 = vset.pattern.permute.xlu1 %v476_v18 }
  0x17   :  { %v40_v19 = vmul.f32 -1.0, %v39_v17  ;;  %259 = vperm.xlu1 %398, %v24_v0  }
  0x18   :  { %399 = vset.pattern.permute.xlu2 %v477_v20 }
  0x19   :  { %81 = vperm.xlu0 %392, %v40_v19   ;;  %287 = vperm.xlu2 %399, %v24_v0  }
  0x1f   :  { %400 = vset.pattern.permute.xlu1 %v478_v21 }
  0x20   :  { %315 = vperm.xlu1 %400, %v24_v0  }
  0x21   :  { %397 = vset.pattern.permute.xlu0 %v479_v22 }
  0x22   :  { %231 = vperm.xlu0 %397, %v24_v0  }
  0x2a   :  { %401 = vset.pattern.permute.xlu0 %v478_v21 }
  0x61   :  { %v526_v49 = vpop.permute.xlu2 %175 }
  0x6a   :  { %v530_v5 = vpop.permute.xlu2 %203 }
  0x77   :  { %v61_v24 = vpop.permute.xlu0 %60  ;;  %v524_v32 = vpop.permute.xlu1 %119 }
  0x78   :  { %v63_v34 = vsub.f32 %v42_v25, %v61_v24  ;;  %v64_v35 = vsub.f32 %v43_v26, %v61_v24  ;;  %v65_v36 = vsub.f32 %v44_v27, %v61_v24  ;;  %v66_v37 = vsub.f32 %v45_v28, %v61_v24 }
  0x79   :  { %v67_v38 = vsub.f32 %v46_v29, %v61_v24  ;;  %v68_v39 = vsub.f32 %v47_v30, %v61_v24  ;;  %v69_v40 = vsub.f32 %v48_v31, %v61_v24  ;;  %v70_v41 = vsub.f32 %v49_v33, %v61_v24 }
  0x7a   :  { %v71_v42 = vmul.f32 %v63_v34, %v63_v34  ;;  %v72_v43 = vmul.f32 %v64_v35, %v64_v35  ;;  %v73_v44 = vmul.f32 %v65_v36, %v65_v36  ;;  %v74_v45 = vmul.f32 %v66_v37, %v66_v37 }
  0x7b   :  { %v75_v46 = vmul.f32 %v67_v38, %v67_v38  ;;  %v76_v47 = vmul.f32 %v68_v39, %v68_v39  ;;  %v77_v48 = vmul.f32 %v69_v40, %v69_v40  ;;  %v78_v55 = vmul.f32 %v70_v41, %v70_v41 }
  0x80   :  { %v528_v62 = vpop.permute.xlu1 %147 }
  0x89   :  { %v260_v15 = vpop.permute.xlu1 %259 }
  0x8b   :  { %v82_v50 = vpop.permute.xlu0 %81 }
  0x8c   :  { %v84_v51 = vmul.f32 %v82_v50, %v71_v42  ;;  %v85_v52 = vmul.f32 %v82_v50, %v72_v43  ;;  %v86_v53 = vmul.f32 %v82_v50, %v73_v44  ;;  %v87_v54 = vmul.f32 %v82_v50, %v74_v45  ;;  %v288_v45 = vpop.permute.xlu2 %287 }
  0x8d   :  { %v88_v56 = vmul.f32 %v82_v50, %v75_v46  ;;  %v89_v57 = vmul.f32 %v82_v50, %v76_v47  ;;  %v90_v58 = vmul.f32 %v82_v50, %v77_v48  ;;  %v91_v63 = vmul.f32 %v82_v50, %v78_v55 }
  0x8e   :  { %v92_v59 = vmul.f32 1.442695, %v84_v51  ;;  %v94_v60 = vmul.f32 1.442695, %v85_v52  ;;  %v96_v61 = vmul.f32 1.442695, %v86_v53 }
  0x8f   :  { %v98_v0 = vmul.f32 1.442695, %v87_v54  ;;  %v100_v1 = vmul.f32 1.442695, %v88_v56  ;;  %v102_v2 = vmul.f32 1.442695, %v89_v57 }
  0x90   :  { %404 = vpow2.f32 %v92_v59  ;;  %v104_v3 = vmul.f32 1.442695, %v90_v58  ;;  %v106_v4 = vmul.f32 1.442695, %v91_v63 }
  0x91   :  { %406 = vpow2.f32 %v94_v60 }
  0x92   :  { %408 = vpow2.f32 %v96_v61 }
  0x93   :  { %410 = vpow2.f32 %v98_v0  ;;  %v636_v0 = vpop.permute.xlu1 %315 }
  0x94   :  { %412 = vpow2.f32 %v100_v1 }
  0x95   :  { %414 = vpow2.f32 %v102_v2 }
  0x96   :  { %v532_v6 = vpop.eup %404  ;;  %416 = vpow2.f32 %v104_v3 }
  0x97   :  { %v534_v7 = vpop.eup %406  ;;  %418 = vpow2.f32 %v106_v4  ;;  %108 = vst [vmem:[#allocation2] sm:$0xff] %v532_v6  ;;  %v206_v8 = vperm.slane %v532_v6, 3  ;;  %v262_v9 = vperm.slane %v532_v6, 5  ;;  %v290_v17 = vperm.slane %v532_v6, 6 }
  0x98   :  { %v539_v10 = vpop.eup %408  ;;  %109 = vst [vmem:[#allocation2 + $0x8] sm:$0xff] %v534_v7  ;;  %v207_v11 = vperm.slane %v534_v7, 3  ;;  %v263_v12 = vperm.slane %v534_v7, 5  ;;  %v291_v21 = vperm.slane %v534_v7, 6  ;;  %v318_v22 = vperm.slane %v532_v6, 7 }
  0x99   :  { %v546_v13 = vpop.eup %410  ;;  %110 = vst [vmem:[#allocation2 + $0x10] sm:$0xff] %v539_v10  ;;  %v208_v14 = vperm.slane %v539_v10, 3  ;;  %v264_v16 = vperm.slane %v539_v10, 5  ;;  %v567_v25 = vmul.f32 %v206_v8, %v530_v5  ;;  %v570_v27 = vmul.f32 %v262_v9, %v260_v15 }
  0x9a   :  { %v555_v18 = vpop.eup %412  ;;  %111 = vst [vmem:[#allocation2 + $0x18] sm:$0xff] %v546_v13  ;;  %v209_v19 = vperm.slane %v546_v13, 3  ;;  %v265_v20 = vperm.slane %v546_v13, 5  ;;  %v577_v30 = vmul.f32 %v207_v11, %v530_v5  ;;  %v580_v33 = vmul.f32 %v263_v12, %v260_v15 }
  0x9b   :  { %v562_v23 = vpop.eup %414  ;;  %112 = vst [vmem:[#allocation2 + $0x20] sm:$0xff] %v555_v18  ;;  %v210_v24 = vperm.slane %v555_v18, 3  ;;  %v266_v26 = vperm.slane %v555_v18, 5  ;;  %v588_v36 = vmul.f32 %v208_v14, %v530_v5  ;;  %v591_v38 = vmul.f32 %v264_v16, %v260_v15 }
  0x9c   :  { %v572_v28 = vpop.eup %416  ;;  %113 = vst [vmem:[#allocation2 + $0x28] sm:$0xff] %v562_v23  ;;  %v211_v29 = vperm.slane %v562_v23, 3  ;;  %v267_v31 = vperm.slane %v562_v23, 5  ;;  %v595_v40 = vmul.f32 %v209_v19, %v530_v5  ;;  %v598_v42 = vmul.f32 %v265_v20, %v260_v15 }
  0x9d   :  { %v583_v34 = vpop.eup %418  ;;  %114 = vst [vmem:[#allocation2 + $0x30] sm:$0xff] %v572_v28  ;;  %v212_v35 = vperm.slane %v572_v28, 3  ;;  %v268_v37 = vperm.slane %v572_v28, 5  ;;  %v603_v43 = vmul.f32 %v210_v24, %v530_v5  ;;  %v605_v44 = vmul.f32 %v266_v26, %v260_v15 }
  0x9e   :  { %v213_v39 = vperm.slane %v583_v34, 3  ;;  %v269_v41 = vperm.slane %v583_v34, 5  ;;  %116 = vst.msk [vmem:[#allocation2 + $0x38] sm:$0xff] %vm115_vm4, %v583_v34  ;;  %v292_v46 = vperm.slane %v539_v10, 6  ;;  %v293_v47 = vperm.slane %v546_v13, 6 }
  0x9f   :  { %360 = dma.vmem_to_hbm [thread:$0]  %s356_s3, 1024, %s358_s26, [#allocation3]   ;;  %v610_v48 = vmul.f32 %v211_v29, %v530_v5  ;;  %v612_v50 = vmul.f32 %v267_v31, %v260_v15  ;;  %v294_v51 = vperm.slane %v555_v18, 6  ;;  %v295_v52 = vperm.slane %v562_v23, 6 }
  0xa0   :  { %v617_v53 = vmul.f32 %v212_v35, %v530_v5  ;;  %v619_v54 = vmul.f32 %v268_v37, %v260_v15  ;;  %v296_v55 = vperm.slane %v572_v28, 6  ;;  %v297_v56 = vperm.slane %v583_v34, 6 }
  0xa1   :  { %v624_v57 = vmul.f32 %v213_v39, %v530_v5  ;;  %v626_v58 = vmul.f32 %v269_v41, %v260_v15  ;;  %v628_v59 = vmul.f32 %v290_v17, %v288_v45  ;;  %v630_v60 = vmul.f32 %v291_v21, %v288_v45 }
  0xa2   :  { %v632_v61 = vmul.f32 %v292_v46, %v288_v45  ;;  %v634_v63 = vmul.f32 %v293_v47, %v288_v45  ;;  %v319_v1 = vperm.slane %v534_v7, 7  ;;  %v320_v2 = vperm.slane %v539_v10, 7 }
  0xa3   :  { %v640_v3 = vmul.f32 %v294_v51, %v288_v45  ;;  %v642_v4 = vmul.f32 %v295_v52, %v288_v45  ;;  %v644_v5 = vmul.f32 %v296_v55, %v288_v45  ;;  %v321_v8 = vperm.slane %v546_v13, 7 }
  0xa4   :  { %v647_v9 = vmul.f32 %v297_v56, %v288_v45  ;;  %v654_v16 = vmul.f32 %v318_v22, %v636_v0  ;;  %v657_v17 = vmul.f32 %v319_v1, %v636_v0  ;;  %v660_v19 = vmul.f32 %v320_v2, %v636_v0 }
  0xa5   :  { %v663_v20 = vmul.f32 %v321_v8, %v636_v0  ;;  %v122_v21 = vperm.slane %v532_v6, 0  ;;  %v123_v24 = vperm.slane %v534_v7, 0  ;;  %v124_v26 = vperm.slane %v539_v10, 0 }
  0xa6   :  { %771 = vst [vmem:[#allocation8_spill] sm:$0xff] %v647_v9  ;;  %v125_v29 = vperm.slane %v546_v13, 0  ;;  %v126_v22 = vperm.slane %v555_v18, 0  ;;  %v127_v31 = vperm.slane %v562_v23, 0  ;;  %v128_v35 = vperm.slane %v572_v28, 0 }
  0xa7   :  { %772 = vst [vmem:[#allocation9_spill] sm:$0xff] %v654_v16  ;;  %v129_v37 = vperm.slane %v583_v34, 0  ;;  %v130_v39 = vmul.f32 %v122_v21, %v524_v32  ;;  %v131_v41 = vmul.f32 %v123_v24, %v524_v32  ;;  %v132_v45 = vmul.f32 %v124_v26, %v524_v32 }
  0xa8   :  { %773 = vst [vmem:[#allocation10_spill] sm:$0xff] %v657_v17  ;;  %v133_v46 = vmul.f32 %v125_v29, %v524_v32  ;;  %v134_v47 = vmul.f32 %v126_v22, %v524_v32  ;;  %v135_v51 = vmul.f32 %v127_v31, %v524_v32  ;;  %v136_v52 = vmul.f32 %v128_v35, %v524_v32 }
  0xa9   :  { %774 = vst [vmem:[#allocation11_spill] sm:$0xff] %v660_v19  ;;  %v137_v55 = vmul.f32 %v129_v37, %v524_v32  ;;  %v150_v56 = vperm.slane %v532_v6, 1  ;;  %v151_v1 = vperm.slane %v534_v7, 1  ;;  %v152_v2 = vperm.slane %v539_v10, 1 }
  0xaa   :  { %775 = vst [vmem:[#allocation12_spill] sm:$0xff] %v663_v20  ;;  %v153_v8 = vperm.slane %v546_v13, 1  ;;  %v154_v21 = vperm.slane %v555_v18, 1  ;;  %v155_v24 = vperm.slane %v562_v23, 1  ;;  %v156_v26 = vperm.slane %v572_v28, 1 }
  0xab   :  { %v157_v29 = vperm.slane %v583_v34, 1  ;;  %v158_v22 = vmul.f32 %v150_v56, %v528_v62  ;;  %v159_v32 = vmul.f32 %v151_v1, %v528_v62  ;;  %v160_v31 = vmul.f32 %v152_v2, %v528_v62 }
  0xac   :  { %v161_v35 = vmul.f32 %v153_v8, %v528_v62  ;;  %v162_v37 = vmul.f32 %v154_v21, %v528_v62  ;;  %v163_v15 = vmul.f32 %v155_v24, %v528_v62  ;;  %v164_v14 = vmul.f32 %v156_v26, %v528_v62 }
  0xad   :  { %v165_v12 = vmul.f32 %v157_v29, %v528_v62  ;;  %v166_v11 = vadd.f32 %v158_v22, %v130_v39  ;;  %v167_v20 = vadd.f32 %v159_v32, %v131_v41  ;;  %v168_v9 = vadd.f32 %v160_v31, %v132_v45 }
  0xae   :  { %v169_v19 = vadd.f32 %v161_v35, %v133_v46  ;;  %v170_v17 = vadd.f32 %v162_v37, %v134_v47  ;;  %v171_v56 = vadd.f32 %v163_v15, %v135_v51  ;;  %v172_v16 = vadd.f32 %v164_v14, %v136_v52 }
  0xaf   :  { %v173_v1 = vadd.f32 %v165_v12, %v137_v55  ;;  %v178_v2 = vperm.slane %v532_v6, 2  ;;  %v179_v8 = vperm.slane %v534_v7, 2  ;;  %v180_v21 = vperm.slane %v539_v10, 2 }
  0xb0   :  { %v181_v24 = vperm.slane %v546_v13, 2  ;;  %v182_v26 = vperm.slane %v555_v18, 2  ;;  %v183_v62 = vperm.slane %v562_v23, 2  ;;  %v184_v39 = vperm.slane %v572_v28, 2 }
  0xb1   :  { %v185_v41 = vperm.slane %v583_v34, 2  ;;  %v186_v15 = vmul.f32 %v178_v2, %v526_v49  ;;  %v187_v12 = vmul.f32 %v179_v8, %v526_v49  ;;  %v188_v14 = vmul.f32 %v180_v21, %v526_v49 }
  0xb2   :  { %v189_v45 = vmul.f32 %v181_v24, %v526_v49  ;;  %v190_v46 = vmul.f32 %v182_v26, %v526_v49  ;;  %v191_v47 = vmul.f32 %v183_v62, %v526_v49  ;;  %v192_v51 = vmul.f32 %v184_v39, %v526_v49  ;;  %v232_v26 = vpop.permute.xlu0 %231 }
  0xb3   :  { %v193_v52 = vmul.f32 %v185_v41, %v526_v49  ;;  %v194_v55 = vadd.f32 %v186_v15, %v166_v11  ;;  %v195_v29 = vadd.f32 %v187_v12, %v167_v20  ;;  %v196_v22 = vadd.f32 %v188_v14, %v168_v9 }
  0xb4   :  { %v197_v32 = vadd.f32 %v189_v45, %v169_v19  ;;  %v198_v31 = vadd.f32 %v190_v46, %v170_v17  ;;  %v199_v35 = vadd.f32 %v191_v47, %v171_v56  ;;  %v200_v37 = vadd.f32 %v192_v51, %v172_v16 }
  0xb5   :  { %v201_v2 = vadd.f32 %v193_v52, %v173_v1  ;;  %v222_v8 = vadd.f32 %v567_v25, %v194_v55  ;;  %v223_v21 = vadd.f32 %v577_v30, %v195_v29  ;;  %v224_v24 = vadd.f32 %v588_v36, %v196_v22 }
  0xb6   :  { %v225_v62 = vadd.f32 %v595_v40, %v197_v32  ;;  %v226_v39 = vadd.f32 %v603_v43, %v198_v31  ;;  %v227_v49 = vadd.f32 %v610_v48, %v199_v35  ;;  %v228_v9 = vadd.f32 %v617_v53, %v200_v37 }
  0xb7   :  { %v229_v11 = vadd.f32 %v624_v57, %v201_v2  ;;  %v234_v16 = vperm.slane %v532_v6, 4  ;;  %v235_v17 = vperm.slane %v534_v7, 4  ;;  %v236_v25 = vperm.slane %v539_v10, 4  ;;  %v777_v2 = vld [vmem:[#allocation9_spill] sm:$0xff] }
  0xb8   :  { %v237_v30 = vperm.slane %v546_v13, 4  ;;  %v238_v36 = vperm.slane %v555_v18, 4  ;;  %v239_v40 = vperm.slane %v562_v23, 4  ;;  %v240_v43 = vperm.slane %v572_v28, 4 }
  0xb9   :  { %v241_v48 = vperm.slane %v583_v34, 4  ;;  %v242_v19 = vmul.f32 %v234_v16, %v232_v26  ;;  %v243_v53 = vmul.f32 %v235_v17, %v232_v26  ;;  %v244_v20 = vmul.f32 %v236_v25, %v232_v26 }
  0xba   :  { %v245_v57 = vmul.f32 %v237_v30, %v232_v26  ;;  %v246_v56 = vmul.f32 %v238_v36, %v232_v26  ;;  %v247_v6 = vmul.f32 %v239_v40, %v232_v26  ;;  %v248_v1 = vmul.f32 %v240_v43, %v232_v26 }
  0xbb   :  { %v249_v7 = vmul.f32 %v241_v48, %v232_v26  ;;  %v250_v41 = vadd.f32 %v242_v19, %v222_v8  ;;  %v251_v10 = vadd.f32 %v243_v53, %v223_v21  ;;  %v252_v15 = vadd.f32 %v244_v20, %v224_v24  ;;  %v778_v8 = vld [vmem:[#allocation10_spill] sm:$0xff]  ;;  %v779_v21 = vld [vmem:[#allocation11_spill] sm:$0xff] }
  0xbc   :  { %v253_v13 = vadd.f32 %v245_v57, %v225_v62  ;;  %v254_v12 = vadd.f32 %v246_v56, %v226_v39  ;;  %v255_v14 = vadd.f32 %v247_v6, %v227_v49  ;;  %v256_v45 = vadd.f32 %v248_v1, %v228_v9  ;;  %v782_v62 = vld [vmem:[#allocation12_spill] sm:$0xff] }
  0xbd   :  { %v257_v46 = vadd.f32 %v249_v7, %v229_v11  ;;  %v278_v47 = vadd.f32 %v570_v27, %v250_v41  ;;  %v279_v51 = vadd.f32 %v580_v33, %v251_v10  ;;  %v280_v52 = vadd.f32 %v591_v38, %v252_v15 }
  0xbe   :  { %v281_v55 = vadd.f32 %v598_v42, %v253_v13  ;;  %v282_v29 = vadd.f32 %v605_v44, %v254_v12  ;;  %v283_v22 = vadd.f32 %v612_v50, %v255_v14  ;;  %v284_v32 = vadd.f32 %v619_v54, %v256_v45 }
  0xbf   :  { %v285_v31 = vadd.f32 %v626_v58, %v257_v46  ;;  %v306_v35 = vadd.f32 %v628_v59, %v278_v47  ;;  %v307_v37 = vadd.f32 %v630_v60, %v279_v51  ;;  %v308_v27 = vadd.f32 %v632_v61, %v280_v52 }
  0xc0   :  { %v776_v33 = vperm.slane %v555_v18, 7  ;;  %v309_v42 = vadd.f32 %v634_v63, %v281_v55  ;;  %v310_v44 = vadd.f32 %v640_v3, %v282_v29  ;;  %v311_v50 = vadd.f32 %v642_v4, %v283_v22  ;;  %v781_v18 = vld [vmem:[#allocation8_spill] sm:$0xff] }
  0xc1   :  { %v312_v54 = vadd.f32 %v644_v5, %v284_v32  ;;  %v334_v58 = vadd.f32 %v777_v2, %v306_v35  ;;  %v335_v59 = vadd.f32 %v778_v8, %v307_v37  ;;  %v336_v60 = vadd.f32 %v779_v21, %v308_v27 }
  0xc2   :  { %v330_v38 = vmul.f32 %v776_v33, %v636_v0  ;;  %v780_v61 = vperm.slane %v562_v23, 7  ;;  %v313_v26 = vadd.f32 %v781_v18, %v285_v31  ;;  %v337_v63 = vadd.f32 %v782_v62, %v309_v42 }
  0xc3   :  { %v783_v3 = vperm.slane %v572_v28, 7  ;;  %342 = vst [vmem:[#allocation4] sm:$0xff] %v334_v58  ;;  %v784_v5 = vperm.slane %v583_v34, 7 }
  0xc4   :  { %v331_v24 = vmul.f32 %v780_v61, %v636_v0  ;;  %v338_v39 = vadd.f32 %v330_v38, %v310_v44  ;;  %343 = vst [vmem:[#allocation4 + $0x8] sm:$0xff] %v335_v59 }
  0xc5   :  { %v332_v4 = vmul.f32 %v783_v3, %v636_v0  ;;  %v333_v49 = vmul.f32 %v784_v5, %v636_v0  ;;  %344 = vst [vmem:[#allocation4 + $0x10] sm:$0xff] %v336_v60 }
  0xc6   :  { %v339_v9 = vadd.f32 %v331_v24, %v311_v50  ;;  %345 = vst [vmem:[#allocation4 + $0x18] sm:$0xff] %v337_v63 }
  0xc7   :  { %v340_v11 = vadd.f32 %v332_v4, %v312_v54  ;;  %v341_v23 = vadd.f32 %v333_v49, %v313_v26  ;;  %346 = vst [vmem:[#allocation4 + $0x20] sm:$0xff] %v338_v39 }
  0xc8   :  { %347 = vst [vmem:[#allocation4 + $0x28] sm:$0xff] %v339_v9 }
  0xc9   :  { %348 = vst [vmem:[#allocation4 + $0x30] sm:$0xff] %v340_v11 }
  0xca   :  { %349 = vst.msk [vmem:[#allocation4 + $0x38] sm:$0xff] %vm115_vm4, %v341_v23 }
  0xcb   :  { %371 = dma.vmem_to_hbm [thread:$0]  %s367_s27, 1024, %s369_s30, [#allocation5]  }
  0xcc   :  { %468 = dma.done.wait [#allocation3], 1024  }
  0xcd   :  { %469 = vsyncadd [#allocation3], 4294966272 }
  0xce   :  { %470 = dma.done.wait [#allocation5], 1024  }
  0xcf   :  { %471 = vsyncadd [#allocation5], 4294966272 }
  0xd0   :  { %380 = vsyncpa [#allocation3], 1 }
  0xd1   :  { %381 = vsyncpa [#allocation5], 1 }

</bundles_post_ra>
